<compile_context>
chip_gen: v7x
topology: tpu7x:2x2x1
jax: 0.10.0
libtpu: 0.0.40
codegen_flags: <defaults>
</compile_context>

<pallas_src>
import functools

import jax
import jax.numpy as jnp
import numpy as np
from jax.experimental import pallas as pl
from jax.experimental.pallas import tpu as pltpu

_BN_EPS = 1e-5


def _swish(u):
    # u * sigmoid(u), with sigmoid written via the exact tanh identity so the
    # transcendental runs on the EUP (no VPU divide).
    return u * (0.5 * jnp.tanh(0.5 * u) + 0.5)


def _res_block_kernel(x_ref, w_ref, v_ref, out_ref, mean_ref, m2_ref, *, n, c, l):
    """grid = (2, N): pass 0 accumulates BN batch stats, pass 1 emits output.

    x_ref   : (1, C, L) f32   one batch row (length on lanes, channels on sublanes)
    w_ref   : (3, C, 3C) bf16 conv weights, matmul-ready (taps stacked on K)
    v_ref   : (C, 8)    f32   columns: [b1, b2, b3, gamma, beta, 0, 0, 0]
    out_ref : (1, C, L) f32
    mean_ref, m2_ref : (C, 1) f32 scratch; persist across grid steps
    """
    p = pl.program_id(0)          # 0 = stats pass, 1 = emit pass
    b = pl.program_id(1)          # batch row

    x = x_ref[0]                                              # (C, L) f32
    lane = jax.lax.broadcasted_iota(jnp.int32, (c, l), 1)     # lane index

    def conv_k3(h, w_idx, bias_col):
        # One k=3 / pad=1 conv as a single bf16 MXU matmul over (tap, channel).
        h_m1 = jnp.where(lane >= 1, pltpu.roll(h, 1, axis=1), 0.0)          # h[l-1]
        h_p1 = jnp.where(lane <= l - 2, pltpu.roll(h, l - 1, axis=1), 0.0)  # h[l+1]
        stacked = jnp.concatenate([h_m1, h, h_p1], axis=0)                  # (3C, L)
        y = jnp.dot(w_ref[w_idx], stacked.astype(jnp.bfloat16),
                    preferred_element_type=jnp.float32)                     # (C, L) f32
        return y + v_ref[:, bias_col:bias_col + 1]

    # conv1 -> conv2.  Recomputed in pass 1 instead of keeping an (N, C, L)
    # intermediate resident: per-step live data stays O(C*L).
    h = conv_k3(x, 0, 0)
    h = conv_k3(h, 1, 1)

    @pl.when(p == 0)
    def _accumulate_stats():
        @pl.when(b == 0)
        def _init():
            mean_ref[...] = jnp.zeros_like(mean_ref)
            m2_ref[...] = jnp.zeros_like(m2_ref)

        # Per-row stats merged with Chan's parallel-variance formula
        # (numerically safe: no E[x^2] - E[x]^2 cancellation).
        blk_mean = jnp.sum(h, axis=1, keepdims=True) * (1.0 / l)            # (C, 1)
        d = h - blk_mean
        blk_m2 = jnp.sum(d * d, axis=1, keepdims=True)                      # (C, 1)
        n_old = (b * l).astype(jnp.float32)
        n_new = n_old + float(l)
        delta = blk_mean - mean_ref[...]
        mean_ref[...] = mean_ref[...] + delta * (float(l) / n_new)
        m2_ref[...] = m2_ref[...] + blk_m2 + (delta * delta) * (n_old * float(l) / n_new)
        # Keep the outgoing block initialized (it is rewritten in pass 1).
        out_ref[0] = x

    @pl.when(p == 1)
    def _emit():
        # BatchNorm1d(C), training mode: batch mean / biased variance.
        var = m2_ref[...] * (1.0 / float(n * l))
        rstd = jax.lax.rsqrt(var + _BN_EPS)
        gamma = v_ref[:, 3:4]
        beta = v_ref[:, 4:5]
        hn = (h - mean_ref[...]) * (rstd * gamma) + beta
        act = _swish(hn)
        y = conv_k3(act, 2, 2)
        out_ref[0] = x + 0.1 * y


@jax.jit
def residual_block_4l(x, params):
    """x: (N, C, L) float32 (PyTorch NCL layout).  Returns (N, C, L) float32."""
    n, c, l = x.shape

    def flat(w):  # (C, C, 3) -> (C, 3C), K ordered as (tap, in-channel)
        return jnp.transpose(w, (0, 2, 1)).reshape(c, 3 * c)

    # Packed parameter slabs (2 inputs instead of 11 tiny ones).
    w_slab = jnp.stack([flat(params["w1"]), flat(params["w2"]),
                        flat(params["w3"])]).astype(jnp.bfloat16)           # (3, C, 3C)
    zero = jnp.zeros((c,), jnp.float32)
    v_slab = jnp.stack([params["b1"], params["b2"], params["b3"],
                        params["gamma"], params["beta"], zero, zero, zero],
                       axis=1).astype(jnp.float32)                          # (C, 8)

    kernel = functools.partial(_res_block_kernel, n=n, c=c, l=l)
    return pl.pallas_call(
        kernel,
        out_shape=jax.ShapeDtypeStruct((n, c, l), jnp.float32),
        grid_spec=pltpu.PrefetchScalarGridSpec(
            num_scalar_prefetch=0,
            grid=(2, n),                                   # (pass, batch-row)
            in_specs=[
                pl.BlockSpec((1, c, l), lambda p, b: (b, 0, 0)),       # x row
                pl.BlockSpec((3, c, 3 * c), lambda p, b: (0, 0, 0)),   # weights (resident)
                pl.BlockSpec((c, 8), lambda p, b: (0, 0)),             # biases/BN (resident)
            ],
            out_specs=pl.BlockSpec((1, c, l), lambda p, b: (b, 0, 0)),
            scratch_shapes=[pltpu.VMEM((c, 1), jnp.float32),   # running mean
                            pltpu.VMEM((c, 1), jnp.float32)],  # running M2
        ),
        compiler_params=pltpu.CompilerParams(
            # Both axes carry state (pass ordering, cross-row BN accumulation).
            dimension_semantics=("arbitrary", "arbitrary")),
    )(x.astype(jnp.float32), w_slab, v_slab)


# ---------------------------------------------------------------------------
# Deterministic parameter init (PyTorch Conv1d / BatchNorm1d defaults).
# ---------------------------------------------------------------------------
def init_params(key, dim):
    def conv_init(k, co, ci, ksize=3):
        bound = 1.0 / np.sqrt(ci * ksize)
        kw, kb = jax.random.split(k)
        w = jax.random.uniform(kw, (co, ci, ksize), jnp.float32, -bound, bound)
        b = jax.random.uniform(kb, (co,), jnp.float32, -bound, bound)
        return w, b

    ks = jax.random.split(key, 3)
    w1, b1 = conv_init(ks[0], dim, dim)
    w2, b2 = conv_init(ks[1], dim, dim)
    w3, b3 = conv_init(ks[2], dim, dim)
    return dict(w1=w1, b1=b1, w2=w2, b2=b2, w3=w3, b3=b3,
                gamma=jnp.ones((dim,), jnp.float32),
                beta=jnp.zeros((dim,), jnp.float32))


# ---------------------------------------------------------------------------
# Pure-JAX references (direct transcription of the PyTorch forward).
# ---------------------------------------------------------------------------
def reference_forward(x, params, *, bf16_matmul):
    """bf16_matmul=True  -> convs use bf16 operands + f32 accumulation,
                            i.e. the exact MXU precision of the kernel.
       bf16_matmul=False -> full-f32 (HIGHEST) reference."""
    op_dt = jnp.bfloat16 if bf16_matmul else jnp.float32
    prec = None if bf16_matmul else jax.lax.Precision.HIGHEST

    def conv1d_k3_p1(h, w, bias):
        _, _, l_ = h.shape
        hp = jnp.pad(h, ((0, 0), (0, 0), (1, 1)))
        taps = jnp.stack([hp[:, :, 0:l_], hp[:, :, 1:l_ + 1], hp[:, :, 2:l_ + 2]],
                         axis=-1)                                   # (N, C, L, 3)
        y = jnp.einsum("ock,nclk->nol", w.astype(op_dt), taps.astype(op_dt),
                       precision=prec, preferred_element_type=jnp.float32)
        return y + bias[None, :, None]

    def bn_swish(h, g, be):
        mean = jnp.mean(h, axis=(0, 2), keepdims=True)
        var = jnp.mean((h - mean) ** 2, axis=(0, 2), keepdims=True)  # biased (training)
        hn = (h - mean) * jax.lax.rsqrt(var + _BN_EPS) * g[None, :, None] + be[None, :, None]
        return _swish(hn)

    h = conv1d_k3_p1(x, params["w1"], params["b1"])
    h = conv1d_k3_p1(h, params["w2"], params["b2"])
    h = bn_swish(h, params["gamma"], params["beta"])
    h = conv1d_k3_p1(h, params["w3"], params["b3"])
    return x + 0.1 * h


if __name__ == "__main__":
    key = jax.random.PRNGKey(0)
    k_x, k_p = jax.random.split(key)

    N, DIM, L = 4, 16, 128
    x = jax.random.normal(k_x, (N, DIM, L), dtype=jnp.float32)
    params = init_params(k_p, DIM)

    out = jax.block_until_ready(residual_block_4l(x, params))
    assert out.shape == (N, DIM, L), out.shape

    # Precision-matched reference (same bf16-operand / f32-accumulate matmuls
    # as the kernel's MXU path): tight tolerance.
    ref_matched = jax.block_until_ready(reference_forward(x, params, bf16_matmul=True))
    np.testing.assert_allclose(np.asarray(out), np.asarray(ref_matched),
                               rtol=1e-3, atol=1e-3)

    # Full-f32 reference: looser tolerance accounts for bf16 MXU rounding.
    ref_f32 = jax.block_until_ready(reference_forward(x, params, bf16_matmul=False))
    np.testing.assert_allclose(np.asarray(out), np.asarray(ref_f32),
                               rtol=2e-2, atol=2e-2)

    print("KERNEL_OK")
</pallas_src>

<mosaic_0001>
module attributes {stable_mosaic.version = 11 : i64} {
  func.func @_res_block_kernel(%arg0: i32, %arg1: i32, %arg2: memref<1x16x128xf32, #tpu.memory_space<vmem>>, %arg3: memref<3x16x48xbf16, #tpu.memory_space<vmem>>, %arg4: memref<16x8xf32, #tpu.memory_space<vmem>>, %arg5: memref<1x16x128xf32, #tpu.memory_space<vmem>>, %arg6: memref<16x1xf32, #tpu.memory_space<vmem>>, %arg7: memref<16x1xf32, #tpu.memory_space<vmem>>) attributes {dimension_semantics = [#tpu.dimension_semantics<arbitrary>, #tpu.dimension_semantics<arbitrary>], iteration_bounds = array<i64: 2, 4>, scalar_prefetch = 0 : i64, scratch_operands = 2 : i64, tpu.core_type = #tpu.core_type<tc>, window_params = [{transform_indices = @transform_0, window_bounds = array<i64: 1, 16, 128>}, {pipeline_mode = #tpu.pipeline_mode<synchronous>, transform_indices = @transform_1, window_bounds = array<i64: 3, 16, 48>}, {pipeline_mode = #tpu.pipeline_mode<synchronous>, transform_indices = @transform_2, window_bounds = array<i64: 16, 8>}, {transform_indices = @transform_3, window_bounds = array<i64: 1, 16, 128>}]} {
    %c0 = arith.constant 0 : index
    %c0_0 = arith.constant 0 : index
    %c0_1 = arith.constant 0 : index
    %0 = vector.load %arg2[%c0, %c0_0, %c0_1] : memref<1x16x128xf32, #tpu.memory_space<vmem>>, vector<1x16x128xf32>
    %1 = vector.shape_cast %0 : vector<1x16x128xf32> to vector<16x128xf32>
    %2 = tpu.iota {dimensions = array<i32: 1>} : vector<16x128xi32>
    %c1_i32 = arith.constant 1 : i32
    %3 = vector.broadcast %c1_i32 : i32 to vector<16x128xi32>
    %4 = arith.cmpi sge, %2, %3 : vector<16x128xi32>
    %c1_i32_2 = arith.constant 1 : i32
    %5 = tpu.dynamic_rotate %1 by %c1_i32_2 dim 1 : vector<16x128xf32>, i32 -> vector<16x128xf32>
    %cst = arith.constant 0.000000e+00 : f32
    %6 = vector.broadcast %cst : f32 to vector<16x128xf32>
    %7 = arith.select %4, %5, %6 : vector<16x128xi1>, vector<16x128xf32>
    %c126_i32 = arith.constant 126 : i32
    %8 = vector.broadcast %c126_i32 : i32 to vector<16x128xi32>
    %9 = arith.cmpi sle, %2, %8 : vector<16x128xi32>
    %c127_i32 = arith.constant 127 : i32
    %10 = tpu.dynamic_rotate %1 by %c127_i32 dim 1 : vector<16x128xf32>, i32 -> vector<16x128xf32>
    %cst_3 = arith.constant 0.000000e+00 : f32
    %11 = vector.broadcast %cst_3 : f32 to vector<16x128xf32>
    %12 = arith.select %9, %10, %11 : vector<16x128xi1>, vector<16x128xf32>
    %13 = tpu.concatenate %7, %1, %12 in 0 : vector<16x128xf32>, vector<16x128xf32>, vector<16x128xf32> -> vector<48x128xf32>
    %c0_4 = arith.constant 0 : index
    %c0_5 = arith.constant 0 : index
    %c0_6 = arith.constant 0 : index
    %14 = vector.load %arg3[%c0_4, %c0_5, %c0_6] : memref<3x16x48xbf16, #tpu.memory_space<vmem>>, vector<1x16x48xbf16>
    %15 = vector.shape_cast %14 : vector<1x16x48xbf16> to vector<16x48xbf16>
    %16 = arith.truncf %13 : vector<48x128xf32> to vector<48x128xbf16>
    %cst_7 = arith.constant dense<0.000000e+00> : vector<16x128xf32>
    %17 = tpu.matmul %15, %16, %cst_7 {dimension_numbers = #tpu.dot_dimension_numbers<[1], [0], [0], [1], [0, 0, 1, 1], [], []>} : vector<16x48xbf16>, vector<48x128xbf16>, vector<16x128xf32> -> vector<16x128xf32>
    %c0_8 = arith.constant 0 : index
    %c0_9 = arith.constant 0 : index
    %18 = vector.load %arg4[%c0_8, %c0_9] : memref<16x8xf32, #tpu.memory_space<vmem>>, vector<16x1xf32>
    %19 = vector.broadcast %18 : vector<16x1xf32> to vector<16x128xf32>
    %20 = arith.addf %17, %19 : vector<16x128xf32>
    %c1_i32_10 = arith.constant 1 : i32
    %21 = vector.broadcast %c1_i32_10 : i32 to vector<16x128xi32>
    %22 = arith.cmpi sge, %2, %21 : vector<16x128xi32>
    %c1_i32_11 = arith.constant 1 : i32
    %23 = tpu.dynamic_rotate %20 by %c1_i32_11 dim 1 : vector<16x128xf32>, i32 -> vector<16x128xf32>
    %cst_12 = arith.constant 0.000000e+00 : f32
    %24 = vector.broadcast %cst_12 : f32 to vector<16x128xf32>
    %25 = arith.select %22, %23, %24 : vector<16x128xi1>, vector<16x128xf32>
    %c126_i32_13 = arith.constant 126 : i32
    %26 = vector.broadcast %c126_i32_13 : i32 to vector<16x128xi32>
    %27 = arith.cmpi sle, %2, %26 : vector<16x128xi32>
    %c127_i32_14 = arith.constant 127 : i32
    %28 = tpu.dynamic_rotate %20 by %c127_i32_14 dim 1 : vector<16x128xf32>, i32 -> vector<16x128xf32>
    %cst_15 = arith.constant 0.000000e+00 : f32
    %29 = vector.broadcast %cst_15 : f32 to vector<16x128xf32>
    %30 = arith.select %27, %28, %29 : vector<16x128xi1>, vector<16x128xf32>
    %31 = tpu.concatenate %25, %20, %30 in 0 : vector<16x128xf32>, vector<16x128xf32>, vector<16x128xf32> -> vector<48x128xf32>
    %c1 = arith.constant 1 : index
    %c0_16 = arith.constant 0 : index
    %c0_17 = arith.constant 0 : index
    %32 = vector.load %arg3[%c1, %c0_16, %c0_17] : memref<3x16x48xbf16, #tpu.memory_space<vmem>>, vector<1x16x48xbf16>
    %33 = vector.shape_cast %32 : vector<1x16x48xbf16> to vector<16x48xbf16>
    %34 = arith.truncf %31 : vector<48x128xf32> to vector<48x128xbf16>
    %cst_18 = arith.constant dense<0.000000e+00> : vector<16x128xf32>
    %35 = tpu.matmul %33, %34, %cst_18 {dimension_numbers = #tpu.dot_dimension_numbers<[1], [0], [0], [1], [0, 0, 1, 1], [], []>} : vector<16x48xbf16>, vector<48x128xbf16>, vector<16x128xf32> -> vector<16x128xf32>
    %c0_19 = arith.constant 0 : index
    %c1_20 = arith.constant 1 : index
    %36 = vector.load %arg4[%c0_19, %c1_20] : memref<16x8xf32, #tpu.memory_space<vmem>>, vector<16x1xf32>
    %37 = vector.broadcast %36 : vector<16x1xf32> to vector<16x128xf32>
    %38 = arith.addf %35, %37 : vector<16x128xf32>
    %c0_i32 = arith.constant 0 : i32
    %39 = arith.cmpi eq, %arg0, %c0_i32 : i32
    %40 = arith.extui %39 : i1 to i32
    %c0_i32_21 = arith.constant 0 : i32
    %41 = arith.cmpi ne, %40, %c0_i32_21 : i32
    scf.if %41 {
      %c0_i32_24 = arith.constant 0 : i32
      %45 = arith.cmpi eq, %arg1, %c0_i32_24 : i32
      %46 = arith.extui %45 : i1 to i32
      %c0_i32_25 = arith.constant 0 : i32
      %47 = arith.cmpi ne, %46, %c0_i32_25 : i32
      scf.if %47 {
        %cst_45 = arith.constant 0.000000e+00 : f32
        %80 = vector.broadcast %cst_45 : f32 to vector<16x1xf32>
        %c0_46 = arith.constant 0 : index
        %c0_47 = arith.constant 0 : index
        %81 = vector.load %arg6[%c0_46, %c0_47] : memref<16x1xf32, #tpu.memory_space<vmem>>, vector<16x1xf32>
        tpu.vector_store %arg6[%c0_46, %c0_47], %80 {strides = array<i32>} : memref<16x1xf32, #tpu.memory_space<vmem>>, vector<16x1xf32>,
        %cst_48 = arith.constant 0.000000e+00 : f32
        %82 = vector.broadcast %cst_48 : f32 to vector<16x1xf32>
        %c0_49 = arith.constant 0 : index
        %c0_50 = arith.constant 0 : index
        %83 = vector.load %arg7[%c0_49, %c0_50] : memref<16x1xf32, #tpu.memory_space<vmem>>, vector<16x1xf32>
        tpu.vector_store %arg7[%c0_49, %c0_50], %82 {strides = array<i32>} : memref<16x1xf32, #tpu.memory_space<vmem>>, vector<16x1xf32>,
      } else {
      }
      %cst_26 = arith.constant dense<0.000000e+00> : vector<16xf32>
      %48 = vector.multi_reduction <add>, %38, %cst_26 [1] : vector<16x128xf32> to vector<16xf32>
      %49 = vector.shape_cast %48 : vector<16xf32> to vector<16x1xf32>
      %cst_27 = arith.constant 7.812500e-03 : f32
      %50 = vector.broadcast %cst_27 : f32 to vector<16x1xf32>
      %51 = arith.mulf %49, %50 : vector<16x1xf32>
      %52 = vector.broadcast %51 : vector<16x1xf32> to vector<16x128xf32>
      %53 = arith.subf %38, %52 : vector<16x128xf32>
      %54 = arith.mulf %53, %53 : vector<16x128xf32>
      %cst_28 = arith.constant dense<0.000000e+00> : vector<16xf32>
      %55 = vector.multi_reduction <add>, %54, %cst_28 [1] : vector<16x128xf32> to vector<16xf32>
      %56 = vector.shape_cast %55 : vector<16xf32> to vector<16x1xf32>
      %c128_i32 = arith.constant 128 : i32
      %57 = arith.muli %arg1, %c128_i32 : i32
      %58 = arith.sitofp %57 : i32 to f32
      %cst_29 = arith.constant 1.280000e+02 : f32
      %59 = arith.addf %58, %cst_29 : f32
      %c0_30 = arith.constant 0 : index
      %c0_31 = arith.constant 0 : index
      %60 = vector.load %arg6[%c0_30, %c0_31] : memref<16x1xf32, #tpu.memory_space<vmem>>, vector<16x1xf32>
      %61 = arith.subf %51, %60 : vector<16x1xf32>
      %c0_32 = arith.constant 0 : index
      %c0_33 = arith.constant 0 : index
      %62 = vector.load %arg6[%c0_32, %c0_33] : memref<16x1xf32, #tpu.memory_space<vmem>>, vector<16x1xf32>
      %cst_34 = arith.constant 1.280000e+02 : f32
      %63 = arith.divf %cst_34, %59 : f32
      %64 = vector.broadcast %63 : f32 to vector<16x1xf32>
      %65 = arith.mulf %61, %64 : vector<16x1xf32>
      %66 = arith.addf %62, %65 : vector<16x1xf32>
      %c0_35 = arith.constant 0 : index
      %c0_36 = arith.constant 0 : index
      %67 = vector.load %arg6[%c0_35, %c0_36] : memref<16x1xf32, #tpu.memory_space<vmem>>, vector<16x1xf32>
      tpu.vector_store %arg6[%c0_35, %c0_36], %66 {strides = array<i32>} : memref<16x1xf32, #tpu.memory_space<vmem>>, vector<16x1xf32>,
      %c0_37 = arith.constant 0 : index
      %c0_38 = arith.constant 0 : index
      %68 = vector.load %arg7[%c0_37, %c0_38] : memref<16x1xf32, #tpu.memory_space<vmem>>, vector<16x1xf32>
      %69 = arith.addf %68, %56 : vector<16x1xf32>
      %70 = arith.mulf %61, %61 : vector<16x1xf32>
      %cst_39 = arith.constant 1.280000e+02 : f32
      %71 = arith.mulf %58, %cst_39 : f32
      %72 = arith.divf %71, %59 : f32
      %73 = vector.broadcast %72 : f32 to vector<16x1xf32>
      %74 = arith.mulf %70, %73 : vector<16x1xf32>
      %75 = arith.addf %69, %74 : vector<16x1xf32>
      %c0_40 = arith.constant 0 : index
      %c0_41 = arith.constant 0 : index
      %76 = vector.load %arg7[%c0_40, %c0_41] : memref<16x1xf32, #tpu.memory_space<vmem>>, vector<16x1xf32>
      tpu.vector_store %arg7[%c0_40, %c0_41], %75 {strides = array<i32>} : memref<16x1xf32, #tpu.memory_space<vmem>>, vector<16x1xf32>,
      %c0_42 = arith.constant 0 : index
      %c0_43 = arith.constant 0 : index
      %c0_44 = arith.constant 0 : index
      %77 = vector.load %arg5[%c0_42, %c0_43, %c0_44] : memref<1x16x128xf32, #tpu.memory_space<vmem>>, vector<1x16x128xf32>
      %78 = vector.shape_cast %77 : vector<1x16x128xf32> to vector<16x128xf32>
      %79 = vector.shape_cast %1 : vector<16x128xf32> to vector<1x16x128xf32>
      tpu.vector_store %arg5[%c0_42, %c0_43, %c0_44], %79 {strides = array<i32>} : memref<1x16x128xf32, #tpu.memory_space<vmem>>, vector<1x16x128xf32>,
    } else {
    }
    %c1_i32_22 = arith.constant 1 : i32
    %42 = arith.cmpi eq, %arg0, %c1_i32_22 : i32
    %43 = arith.extui %42 : i1 to i32
    %c0_i32_23 = arith.constant 0 : i32
    %44 = arith.cmpi ne, %43, %c0_i32_23 : i32
    scf.if %44 {
      %c0_24 = arith.constant 0 : index
      %c0_25 = arith.constant 0 : index
      %45 = vector.load %arg7[%c0_24, %c0_25] : memref<16x1xf32, #tpu.memory_space<vmem>>, vector<16x1xf32>
      %cst_26 = arith.constant 0.001953125 : f32
      %46 = vector.broadcast %cst_26 : f32 to vector<16x1xf32>
      %47 = arith.mulf %45, %46 : vector<16x1xf32>
      %cst_27 = arith.constant 9.99999974E-6 : f32
      %48 = vector.broadcast %cst_27 : f32 to vector<16x1xf32>
      %49 = arith.addf %47, %48 : vector<16x1xf32>
      %50 = math.rsqrt %49 : vector<16x1xf32>
      %c0_28 = arith.constant 0 : index
      %c3 = arith.constant 3 : index
      %51 = vector.load %arg4[%c0_28, %c3] : memref<16x8xf32, #tpu.memory_space<vmem>>, vector<16x1xf32>
      %c0_29 = arith.constant 0 : index
      %c4 = arith.constant 4 : index
      %52 = vector.load %arg4[%c0_29, %c4] : memref<16x8xf32, #tpu.memory_space<vmem>>, vector<16x1xf32>
      %c0_30 = arith.constant 0 : index
      %c0_31 = arith.constant 0 : index
      %53 = vector.load %arg6[%c0_30, %c0_31] : memref<16x1xf32, #tpu.memory_space<vmem>>, vector<16x1xf32>
      %54 = vector.broadcast %53 : vector<16x1xf32> to vector<16x128xf32>
      %55 = arith.subf %38, %54 : vector<16x128xf32>
      %56 = arith.mulf %50, %51 : vector<16x1xf32>
      %57 = vector.broadcast %56 : vector<16x1xf32> to vector<16x128xf32>
      %58 = arith.mulf %55, %57 : vector<16x128xf32>
      %59 = vector.broadcast %52 : vector<16x1xf32> to vector<16x128xf32>
      %60 = arith.addf %58, %59 : vector<16x128xf32>
      %cst_32 = arith.constant 5.000000e-01 : f32
      %61 = vector.broadcast %cst_32 : f32 to vector<16x128xf32>
      %62 = arith.mulf %61, %60 : vector<16x128xf32>
      %63 = math.tanh %62 : vector<16x128xf32>
      %cst_33 = arith.constant 5.000000e-01 : f32
      %64 = vector.broadcast %cst_33 : f32 to vector<16x128xf32>
      %65 = arith.mulf %64, %63 : vector<16x128xf32>
      %cst_34 = arith.constant 5.000000e-01 : f32
      %66 = vector.broadcast %cst_34 : f32 to vector<16x128xf32>
      %67 = arith.addf %65, %66 : vector<16x128xf32>
      %68 = arith.mulf %60, %67 : vector<16x128xf32>
      %c1_i32_35 = arith.constant 1 : i32
      %69 = vector.broadcast %c1_i32_35 : i32 to vector<16x128xi32>
      %70 = arith.cmpi sge, %2, %69 : vector<16x128xi32>
      %c1_i32_36 = arith.constant 1 : i32
      %71 = tpu.dynamic_rotate %68 by %c1_i32_36 dim 1 : vector<16x128xf32>, i32 -> vector<16x128xf32>
      %cst_37 = arith.constant 0.000000e+00 : f32
      %72 = vector.broadcast %cst_37 : f32 to vector<16x128xf32>
      %73 = arith.select %70, %71, %72 : vector<16x128xi1>, vector<16x128xf32>
      %c126_i32_38 = arith.constant 126 : i32
      %74 = vector.broadcast %c126_i32_38 : i32 to vector<16x128xi32>
      %75 = arith.cmpi sle, %2, %74 : vector<16x128xi32>
      %c127_i32_39 = arith.constant 127 : i32
      %76 = tpu.dynamic_rotate %68 by %c127_i32_39 dim 1 : vector<16x128xf32>, i32 -> vector<16x128xf32>
      %cst_40 = arith.constant 0.000000e+00 : f32
      %77 = vector.broadcast %cst_40 : f32 to vector<16x128xf32>
      %78 = arith.select %75, %76, %77 : vector<16x128xi1>, vector<16x128xf32>
      %79 = tpu.concatenate %73, %68, %78 in 0 : vector<16x128xf32>, vector<16x128xf32>, vector<16x128xf32> -> vector<48x128xf32>
      %c2 = arith.constant 2 : index
      %c0_41 = arith.constant 0 : index
      %c0_42 = arith.constant 0 : index
      %80 = vector.load %arg3[%c2, %c0_41, %c0_42] : memref<3x16x48xbf16, #tpu.memory_space<vmem>>, vector<1x16x48xbf16>
      %81 = vector.shape_cast %80 : vector<1x16x48xbf16> to vector<16x48xbf16>
      %82 = arith.truncf %79 : vector<48x128xf32> to vector<48x128xbf16>
      %cst_43 = arith.constant dense<0.000000e+00> : vector<16x128xf32>
      %83 = tpu.matmul %81, %82, %cst_43 {dimension_numbers = #tpu.dot_dimension_numbers<[1], [0], [0], [1], [0, 0, 1, 1], [], []>} : vector<16x48xbf16>, vector<48x128xbf16>, vector<16x128xf32> -> vector<16x128xf32>
      %c0_44 = arith.constant 0 : index
      %c2_45 = arith.constant 2 : index
      %84 = vector.load %arg4[%c0_44, %c2_45] : memref<16x8xf32, #tpu.memory_space<vmem>>, vector<16x1xf32>
      %85 = vector.broadcast %84 : vector<16x1xf32> to vector<16x128xf32>
      %86 = arith.addf %83, %85 : vector<16x128xf32>
      %cst_46 = arith.constant 1.000000e-01 : f32
      %87 = vector.broadcast %cst_46 : f32 to vector<16x128xf32>
      %88 = arith.mulf %87, %86 : vector<16x128xf32>
      %89 = arith.addf %1, %88 : vector<16x128xf32>
      %c0_47 = arith.constant 0 : index
      %c0_48 = arith.constant 0 : index
      %c0_49 = arith.constant 0 : index
      %90 = vector.load %arg5[%c0_47, %c0_48, %c0_49] : memref<1x16x128xf32, #tpu.memory_space<vmem>>, vector<1x16x128xf32>
      %91 = vector.shape_cast %90 : vector<1x16x128xf32> to vector<16x128xf32>
      %92 = vector.shape_cast %89 : vector<16x128xf32> to vector<1x16x128xf32>
      tpu.vector_store %arg5[%c0_47, %c0_48, %c0_49], %92 {strides = array<i32>} : memref<1x16x128xf32, #tpu.memory_space<vmem>>, vector<1x16x128xf32>,
    } else {
    }
    return
  }
  func.func @transform_0(%arg0: i32, %arg1: i32) -> (i32, i32, i32) {
    %c0_i32 = arith.constant 0 : i32
    %c0_i32_0 = arith.constant 0 : i32
    %c0_i32_1 = arith.constant 0 : i32
    return %arg1, %c0_i32, %c0_i32_0 : i32, i32, i32
  }
  func.func @transform_1(%arg0: i32, %arg1: i32) -> (i32, i32, i32) {
    %c0_i32 = arith.constant 0 : i32
    %c0_i32_0 = arith.constant 0 : i32
    %c0_i32_1 = arith.constant 0 : i32
    %c0_i32_2 = arith.constant 0 : i32
    return %c0_i32, %c0_i32_0, %c0_i32_1 : i32, i32, i32
  }
  func.func @transform_2(%arg0: i32, %arg1: i32) -> (i32, i32) {
    %c0_i32 = arith.constant 0 : i32
    %c0_i32_0 = arith.constant 0 : i32
    %c0_i32_1 = arith.constant 0 : i32
    return %c0_i32, %c0_i32_0 : i32, i32
  }
  func.func @transform_3(%arg0: i32, %arg1: i32) -> (i32, i32, i32) {
    %c0_i32 = arith.constant 0 : i32
    %c0_i32_0 = arith.constant 0 : i32
    %c0_i32_1 = arith.constant 0 : i32
    return %arg1, %c0_i32, %c0_i32_0 : i32, i32, i32
  }
}

</mosaic_0001>

<bundles_post_ra>
// kernel: residual_block_4l.1
= control target key start
LH: loop header
LB: loop body
LE: loop exit
PB: predicated region body
PF: predicated region fallthrough
CT: control target
= control target key end

     0   :  { %8 = vsyncpa [#allocation5], 0  ;;  %s1256_s0 = inlined_call_operand.vmem [shape: f32[4,16,128], index: 0, kind: input, shape index: {}]   ;;  %s1257_s1 = inlined_call_operand.vmem [shape: bf16[3,16,48], index: 1, kind: input, shape index: {}]   ;;  %s1258_s2 = inlined_call_operand.vmem [shape: f32[16,8], index: 2, kind: input, shape index: {}]   ;;  %s1259_s3 = inlined_call_operand.hbm [shape: f32[4,16,128], index: 3, kind: output, shape index: {}]  }
   0x1   :  { %10 = vsyncpa [#allocation5 + $0x1], 0  ;;  %s1011_s12 = smov 0   ;;  %s1013_s13 = smov 0  }
   0x2   :  { %s1015_s14 = smov 0   ;;  %s1017_s15 = smov 0  }
   0x3   :  { %s1019_s16 = smov 0   ;;  %s1021_s17 = smov 0  }
   0x4   :  { %s1023_s18 = smov 0   ;;  %s1025_s19 = smov 0  }
   0x5 LB: > { %s646_s20 = sadd.s32 4294967295, %s971_s19   ;;  %s647_s21 = sadd.s32 4294967294, %s971_s19   ;;  %s971_s19 = sphi %s1025_s19, %s16_s19   ;;  %s967_s18 = sphi %s1023_s18, %s1272_s18   ;;  %s963_s17 = sphi %s1021_s17, %s1271_s17   ;;  %s959_s16 = sphi %s1019_s16, %s1270_s16   ;;  %s955_s15 = sphi %s1017_s15, %s1269_s15   ;;  %s951_s14 = sphi %s1015_s14, %s1268_s14   ;;  %s947_s13 = sphi %s1013_s13, %s1267_s13   ;;  %s943_s12 = sphi %s1011_s12, %s1266_s12  }
   0x6   : > { %s25_s22 = sadd.s32 1, %s963_s17  ;;  %s28_s23 = sadd.s32 1, %s967_s18 }
   0x7   : > { %p26_p0 = scmp.ge.s32.totalorder %s25_s22, 4  ;;  %s103_s24 = sadd.s32 1, %s951_s14 }
   0x8   : > { %p113_p1 = scmp.ne.s32.totalorder %s951_s14, %s947_s13  ;;  %p114_p2 = scmp.eq.s32.totalorder %s646_s20, 7 }
   0x9   : > { %s1274_s22 = smov (%p26_p0, %s25_s22), 0  ;;  %s1276_s23 = smov (!%p26_p0, %s28_s23), %s967_s18 }
   0xa   : > { %s100_s25 = ssub.s32 %s963_s17, %s1274_s22  ;;  %p1063_p3 = por %p114_p2, %p113_p1 }
   0xb   : > { %p30_p4 = scmp.ge.s32.totalorder %s1276_s23, 2  ;;  %p101_p5 = scmp.eq.s32.totalorder %s100_s25, 0 }
   0xc   : > { %p119_p6 = scmp.ne.s32.totalorder %s947_s13, %s943_s12  ;;  %p120_p7 = scmp.eq.s32.totalorder %s647_s21, 7 }
   0xd   : > { %s1278_s23 = smov (%p30_p4, %s1276_s23), 0  ;;  %p650_p9 = scmp.ge.s32.totalorder %s971_s19, 1 }
   0xe   : > { %s1072_s27 = scalar_select %p101_p5, %s951_s14, %s103_s24  }
   0xf   : > { %p1074_p8 = por %p120_p7, %p119_p6  ;;  %p152_p10 = scmp.lt.s32.totalorder %s971_s19, 9 }
  0x11   : > { %p153_p11 = pnand %p650_p9, %p152_p10 }
  0x12   : > { %p176_p12 = scmp.lt.s32.totalorder (!%p153_p11), %s955_s15, 3  ;;  %s173_s29 = sand.u32 (!%p153_p11), 1, %s947_s13   ;;  %v973_v0 = vmov (!%p153_p11), 0.0   ;;  %vm975_vm0 = vmmov (!%p153_p11), 0   ;;  %v205_v5 = vld [vmem:[%s1258_s2] sm:$0xff] (!%p153_p11)  ;;  %v976_v6 = vmov (!%p153_p11), 0   ;;  %v184_v8 = vlaneseq (!%p153_p11) }
  0x13   : > { %156 = sbr.rel (%p153_p11) target bundleno = 1687 (0x697), region = 32  ;;  %705 = vmatprep.subr.bf16.mxu0 (!%p153_p11), %v973_v0  ;;  %715 = vmatprep.subr.bf16.mxu1 (!%p153_p11), %v973_v0  ;;  %s1087_s4 = sshll.u32 (!%p153_p11), %s173_s29, 4  ;;  %v206_v7 = vld [vmem:[%s1258_s2 + $0x8] sm:$0xff] (!%p153_p11)  ;;  %v848_v20 = vld [vmem:[%s1257_s1] sm:$0xff] (!%p153_p11)   ;;  %vm222_vm5 = vcmask (!%p153_p11), 392192   ;;  %v978_v31 = vmov (!%p153_p11), 1  }
  0x14   : > { %s974_s9 = smov (!%p153_p11), 1   ;;  %711 = vmatprep.mubr.msk.bf16.mxu0 (!%p153_p11), %vm975_vm0, %v973_v0  ;;  %721 = vmatprep.mubr.msk.bf16.mxu1 (!%p153_p11), %vm975_vm0, %v973_v0  ;;  %s977_s20 = smov (!%p153_p11), 127   ;;  %v185_v9 = vand.u32 (!%p153_p11), 127, %v184_v8  ;;  %v849_v40 = vld [vmem:[%s1257_s1 + $0x8] sm:$0xff] (!%p153_p11)  }
  0x15   : > { %835 = vset.pattern.permute.xlu1 (!%p153_p11), %v976_v6  ;;  %846 = vset.pattern.permute.xlu0 (!%p153_p11), %v978_v31  ;;  %s1145_s7 = scalar_lea.vmem (!%p153_p11), [#allocation4], %s1087_s4  ;;  %p672_p13 = scmp.ne.s32.totalorder (!%p153_p11), %s959_s16, 0 }
  0x16   : > { %209 = vperm.xlu1 (!%p153_p11), %835, %v205_v5   ;;  %vm186_vm1 = vcmp.ge.s32.totalorder (!%p153_p11), %v185_v9, 1  ;;  %vm193_vm3 = vcmp.le.s32.totalorder (!%p153_p11), %v185_v9, 126 }
  0x17   : > { %vm1110_vm2 = vmpackc.low (!%p153_p11), %vm186_vm1, %vm186_vm1 }
  0x18   : > { %vm1118_vm4 = vmpackc.low (!%p153_p11), %vm193_vm3, %vm193_vm3 }
  0x1a   : > { %s177_s30 = scalar_select %p176_p12, %s955_s15, 3  ;;  %214 = vperm.xlu1 %835, %v206_v7  }
  0x1b   : > { %p673_p0 = scmp.ne.s32.totalorder (!%p672_p13), %s955_s15, 0 }
  0x1c   : > { %s691_s5 = sshll.u32 %s177_s30, 4 }
  0x1d   : > { %s180_s8 = scalar_lea.vmem %s1256_s0, %s691_s5 }
  0x1e   : > { %v1092_v1 = vld [vmem:[%s180_s8] sm:$0xff]  ;;  %v1094_v2 = vld [vmem:[%s180_s8 + $0x8] sm:$0xff]  ;;  %847 = vset.pattern.permute.xlu1 %v978_v31 }
  0x1f   : > { %v825_v3 = vpack.i.bf16 %v1094_v2, %v1092_v1  ;;  %v203_v4 = vpack.c.bf16 %v1094_v2, %v1092_v1 }
  0x21   : > { %826 = vrot.lane.b32.xlu0 %v825_v3, %s974_s9 }
  0x25   : > { %831 = vrot.lane.b32.xlu0 %v825_v3, %s977_s20 }
  0x93   : > { %v827_v10 = vpop.permute.xlu0 %826 }
  0x94   : > { %v829_v11 = vunpack.i.h.bf16 %v827_v10  ;;  %v828_v12 = vunpack.i.l.bf16 %v827_v10 }
  0x95   : > { %v210_v21 = vpop.permute.xlu1 %209 }
  0x96   : > { %v656_v14 = vpack.c.bf16 %v829_v11, %v828_v12 }
  0x97   : > { %v832_v15 = vpop.permute.xlu0 %831 }
  0x98   : > { %706 = vmatpush3.bf16.msk.msra.mxu0 %vm1110_vm2, %v656_v14  ;;  %v834_v16 = vunpack.i.h.bf16 %v832_v15  ;;  %v833_v17 = vunpack.i.l.bf16 %v832_v15 }
  0x99   : > { %707 = vmatprep.subr.bf16.mxu0 %v973_v0  ;;  %v215_v24 = vpop.permute.xlu1 %214 }
  0x9a   : > { %v659_v18 = vpack.c.bf16 %v834_v16, %v833_v17 }
  0x9c   : > { %708 = vmatpush3.bf16.msra.mxu0 %v203_v4 }
  0x9d   : > { %709 = vmatprep.subr.bf16.mxu0 %v973_v0 }
  0xa0   : > { %710 = vmatpush3.bf16.msk.msra.mxu0 %vm1118_vm4, %v659_v18 }
  0xa3   : > { %712 = vmatmul.mubr.msk.bf16.vlgmr.msra.gmra.mrb[0].mxu0 %vm222_vm5, %v848_v20 }
 0x176   : > { %v260_v22 = vpop.f32.mrb[0].mxu0 }
 0x177   : > { %v713_v23 = vpop.f32.mrb[1].mxu0  ;;  %v261_v26 = vadd.f32 %v260_v22, %v210_v21 }
 0x178   : > { %v263_v25 = vpop.f32.mrb[2].mxu0 }
 0x179   : > { %v264_v27 = vadd.f32 %v263_v25, %v215_v24  ;;  %v714_v28 = vpop.f32.mrb[3].mxu0 }
 0x17b   : > { %v841_v29 = vpack.i.bf16 %v264_v27, %v261_v26  ;;  %v283_v30 = vpack.c.bf16 %v264_v27, %v261_v26 }
 0x17d   : > { %842 = vrot.lane.b32.xlu1 %v841_v29, %s977_s20  ;;  %837 = vrot.lane.b32.xlu0 %v841_v29, %s974_s9 }
 0x181   : > { %286 = vperm.xlu0 %846, %v205_v5   ;;  %290 = vperm.xlu1 %847, %v206_v7  }
 0x1ef   : > { %v838_v32 = vpop.permute.xlu0 %837  ;;  %v843_v36 = vpop.permute.xlu1 %842 }
 0x1f0   : > { %v840_v33 = vunpack.i.h.bf16 %v838_v32  ;;  %v839_v34 = vunpack.i.l.bf16 %v838_v32  ;;  %v845_v37 = vunpack.i.h.bf16 %v843_v36  ;;  %v844_v38 = vunpack.i.l.bf16 %v843_v36 }
 0x1f2   : > { %v666_v35 = vpack.c.bf16 %v840_v33, %v839_v34  ;;  %v669_v39 = vpack.c.bf16 %v845_v37, %v844_v38 }
 0x1f4   : > { %716 = vmatpush3.bf16.msk.msra.mxu1 %vm1110_vm2, %v666_v35 }
 0x1f5   : > { %717 = vmatprep.subr.bf16.mxu1 %v973_v0 }
 0x1f8   : > { %718 = vmatpush3.bf16.msra.mxu1 %v283_v30 }
 0x1f9   : > { %719 = vmatprep.subr.bf16.mxu1 %v973_v0 }
 0x1fc   : > { %720 = vmatpush3.bf16.msk.msra.mxu1 %vm1118_vm4, %v669_v39 }
 0x1ff   : > { %722 = vmatmul.mubr.msk.bf16.vlgmr.msra.gmra.mrb[0].mxu1 %vm222_vm5, %v849_v40 }
 0x200   : > { %v287_v41 = vpop.permute.xlu0 %286  ;;  %v291_v43 = vpop.permute.xlu1 %290 }
 0x2cf   : > { %345 = sbr.rel (%p672_p13) target bundleno = 1032 (0x408), region = 36 }
 0x2d2   : > { %v335_v42 = vpop.f32.mrb[0].mxu1 }
 0x2d3   : > { %v1140_v44 = vadd.f32 %v335_v42, %v287_v41  ;;  %v723_v45 = vpop.f32.mrb[1].mxu1 }
 0x2d4   : > { %v338_v46 = vpop.f32.mrb[2].mxu1 }
 0x2d5   : > { %v1142_v47 = vadd.f32 %v338_v46, %v291_v43  ;;  %v724_v48 = vpop.f32.mrb[3].mxu1 }
 0x2d6   : > { %349 = sbr.rel (%p673_p0) target bundleno = 733 (0x2dd), region = 40  ;;  %vm350_vm6 = vcmask (!%p673_p0), 7168   ;;  %v979_v49 = vmov (!%p673_p0), 0.0  }
 0x2d7   : > { %351 = vst.msk [vmem:[#allocation2] sm:$0xff] (!%p673_p0), %vm350_vm6, %v979_v49  ;;  %352 = vst.msk [vmem:[#allocation2 + $0x8] sm:$0xff] (!%p673_p0), %vm350_vm6, %v979_v49 }
 0x2d8   : > { %353 = vst.msk [vmem:[#allocation3] sm:$0xff] (!%p673_p0), %vm350_vm6, %v979_v49  ;;  %354 = vst.msk [vmem:[#allocation3 + $0x8] sm:$0xff] (!%p673_p0), %vm350_vm6, %v979_v49 }
 0x2dd PF: > { %355 = vadd.xlane.f32.xlu0 %v1140_v44  ;;  %s674_s4 = sshll.u32 %s955_s15, 7  ;;  %406 = vst [vmem:[%s1145_s7] sm:$0xff] %v1092_v1  ;;  %407 = vst [vmem:[%s1145_s7 + $0x8] sm:$0xff] %v1094_v2  ;;  %vm385_vm7 = vcmask 7168  }
 0x2de   : > { %s370_s8 = scvt.s32.f32 %s674_s4  ;;  %v372_v53 = vld [vmem:[#allocation2] sm:$0xff]  ;;  %v373_v60 = vld [vmem:[#allocation2 + $0x8] sm:$0xff] }
 0x2df   : > { %v388_v12 = vld [vmem:[#allocation3] sm:$0xff]  ;;  %v389_v16 = vld [vmem:[#allocation3 + $0x8] sm:$0xff] }
 0x2e0   : > { %s371_s9 = sadd.f32 128.0, %s370_s8  ;;  %s394_s10 = smul.f32 128.0, %s370_s8 }
 0x2e1   : > { %357 = vadd.xlane.f32.xlu0 %v1142_v47 }
 0x2e2   : > { %v376_v50 = vstv %s371_s9 }
 0x2e3   : > { %850 = vrcp.f32 %v376_v50 }
 0x2ed   : > { %v851_v51 = vpop.eup %850 }
 0x2ee   : > { %735 = vpush %v851_v51 }
 0x31f   : > { %s736_s11 = spop %735 }
 0x320   : > { %s398_s20 = smul.f32 %s736_s11, %s394_s10 }
 0x321   : > { %s379_s21 = smul.f32 128.0, %s736_s11 }
 0x322   : > { %v399_v58 = vstv %s398_s20 }
 0x323   : > { %v380_v55 = vstv %s379_s21 }
 0x36a   : > { %v356_v52 = vpop.xlane.xlu0 %355 }
 0x36b   : > { %v359_v54 = vmul.f32 0.0078125, %v356_v52 }
 0x36d   : > { %v374_v56 = vsub.f32 %v359_v54, %v372_v53  ;;  %v361_v57 = vsub.f32 %v1140_v44, %v359_v54 }
 0x36e   : > { %v358_v59 = vpop.xlane.xlu0 %357 }
 0x36f   : > { %v381_v61 = vmul.f32 %v380_v55, %v374_v56  ;;  %v392_v62 = vmul.f32 %v374_v56, %v374_v56  ;;  %v360_v63 = vmul.f32 0.0078125, %v358_v59  ;;  %v363_v0 = vmul.f32 %v361_v57, %v361_v57 }
 0x371   : > { %v383_v3 = vadd.f32 %v381_v61, %v372_v53  ;;  %v400_v4 = vmul.f32 %v399_v58, %v392_v62  ;;  %v362_v5 = vsub.f32 %v1142_v47, %v360_v63  ;;  %v375_v6 = vsub.f32 %v360_v63, %v373_v60  ;;  %365 = vadd.xlane.f32.xlu1 %v363_v0 }
 0x373   : > { %v382_v7 = vmul.f32 %v380_v55, %v375_v6  ;;  %386 = vst.msk [vmem:[#allocation2] sm:$0xff] %vm385_vm7, %v383_v3  ;;  %v393_v8 = vmul.f32 %v375_v6, %v375_v6  ;;  %v364_v9 = vmul.f32 %v362_v5, %v362_v5 }
 0x375   : > { %v384_v10 = vadd.f32 %v382_v7, %v373_v60  ;;  %367 = vadd.xlane.f32.xlu1 %v364_v9  ;;  %v401_v11 = vmul.f32 %v399_v58, %v393_v8 }
 0x377   : > { %387 = vst.msk [vmem:[#allocation2 + $0x8] sm:$0xff] %vm385_vm7, %v384_v10 }
 0x3fe   : > { %v366_v14 = vpop.xlane.xlu1 %365 }
 0x3ff   : > { %v390_v15 = vadd.f32 %v388_v12, %v366_v14 }
 0x401   : > { %v402_v17 = vadd.f32 %v400_v4, %v390_v15 }
 0x402   : > { %v368_v18 = vpop.xlane.xlu1 %367 }
 0x403   : > { %404 = vst.msk [vmem:[#allocation3] sm:$0xff] %vm385_vm7, %v402_v17  ;;  %v391_v20 = vadd.f32 %v389_v16, %v368_v18 }
 0x405   : > { %v403_v21 = vadd.f32 %v401_v11, %v391_v20 }
 0x407   : > { %405 = vst.msk [vmem:[#allocation3 + $0x8] sm:$0xff] %vm385_vm7, %v403_v21 }
 0x408 PF: > { %p675_p1 = scmp.ne.s32.totalorder %s959_s16, 1 }
 0x409   : > { %v1166_v22 = vld [vmem:[%s1258_s2] sm:$0xff] (!%p675_p1)  ;;  %s980_s30 = smov (!%p675_p1), 125   ;;  %v981_v24 = vmov (!%p675_p1), 0   ;;  %v1172_v25 = vld [vmem:[%s1258_s2 + $0x8] sm:$0xff] (!%p675_p1)  ;;  %v982_v39 = vmov (!%p675_p1), 4   ;;  %v983_v57 = vmov (!%p675_p1), 0.0  }
 0x40a   : > { %411 = sbr.rel (%p675_p1) target bundleno = 1662 (0x67e), region = 44  ;;  %v422_v23 = vld [vmem:[#allocation2] sm:$0xff] (!%p675_p1)  ;;  %438 = vrot.lane.b32.xlu0 (!%p675_p1), %v1166_v22, %s980_s30  ;;  %852 = vset.pattern.permute.xlu1 (!%p675_p1), %v981_v24  ;;  %v423_v26 = vld [vmem:[#allocation2 + $0x8] sm:$0xff] (!%p675_p1)  ;;  %v412_v27 = vld [vmem:[#allocation3] sm:$0xff] (!%p675_p1)  ;;  %s984_s16 = smov (!%p675_p1), 1   ;;  %vm985_vm8 = vmmov (!%p675_p1), 0  }
 0x40b   : > { %426 = vperm.xlu1 (!%p675_p1), %852, %v422_v23   ;;  %853 = vset.pattern.permute.xlu0 (!%p675_p1), %v981_v24  ;;  %v414_v28 = vmul.f32 (!%p675_p1), 0.001953125, %v412_v27  ;;  %v986_v3 = vmov (!%p675_p1), 2   ;;  %s987_s4 = smov (!%p675_p1), 127   ;;  %v868_v12 = vld [vmem:[%s1257_s1 + $0x10] sm:$0xff] (!%p675_p1)  }
 0x40c   : > { %725 = vmatprep.subr.bf16.mxu0 (!%p675_p1), %v983_v57  ;;  %731 = vmatprep.mubr.msk.bf16.mxu0 (!%p675_p1), %vm985_vm8, %v983_v57 }
 0x40d   : > { %v416_v30 = vadd.f32 (!%p675_p1), 1e-05, %v414_v28 }
 0x40e   : > { %440 = vrot.lane.b32.xlu0 (!%p675_p1), %v1172_v25, %s980_s30  ;;  %v413_v29 = vld [vmem:[#allocation3 + $0x8] sm:$0xff] (!%p675_p1) }
 0x40f   : > { %431 = vperm.xlu1 (!%p675_p1), %852, %v423_v26   ;;  %v415_v31 = vmul.f32 (!%p675_p1), 0.001953125, %v413_v29  ;;  %869 = vrsqrt.f32 (!%p675_p1), %v416_v30 }
 0x411   : > { %v417_v32 = vadd.f32 1e-05, %v415_v31 }
 0x413   : > { %871 = vrsqrt.f32 %v417_v32 }
 0x419   : > { %v870_v33 = vpop.eup %869 }
 0x41d   : > { %v872_v36 = vpop.eup %871 }
 0x47c   : > { %v439_v34 = vpop.permute.xlu0 %438 }
 0x47d   : > { %v444_v35 = vmul.f32 %v870_v33, %v439_v34 }
 0x47f   : > { %448 = vperm.xlu0 %853, %v444_v35  }
 0x480   : > { %v441_v37 = vpop.permute.xlu0 %440 }
 0x481   : > { %v445_v38 = vmul.f32 %v872_v36, %v441_v37 }
 0x483   : > { %453 = vperm.xlu1 %852, %v445_v38   ;;  %855 = vset.pattern.permute.xlu0 %v982_v39 }
 0x484   : > { %463 = vperm.xlu0 %855, %v1172_v25  }
 0x487   : > { %854 = vset.pattern.permute.xlu1 %v982_v39 }
 0x488   : > { %459 = vperm.xlu1 %854, %v1166_v22   ;;  %866 = vset.pattern.permute.xlu0 %v986_v3 }
 0x489   : > { %497 = vperm.xlu0 %866, %v1166_v22  }
 0x48a   : > { %v427_v40 = vpop.permute.xlu1 %426 }
 0x48b   : > { %v434_v49 = vsub.f32 %v1140_v44, %v427_v40 }
 0x48c   : > { %867 = vset.pattern.permute.xlu1 %v986_v3 }
 0x48e   : > { %v432_v41 = vpop.permute.xlu1 %431 }
 0x48f   : > { %v435_v43 = vsub.f32 %v1142_v47, %v432_v41 }
 0x4fe   : > { %v449_v42 = vpop.permute.xlu0 %448 }
 0x4ff   : > { %v456_v51 = vmul.f32 %v449_v42, %v434_v49 }
 0x502   : > { %v454_v45 = vpop.permute.xlu1 %453 }
 0x503   : > { %v457_v46 = vmul.f32 %v454_v45, %v435_v43  ;;  %v464_v48 = vpop.permute.xlu0 %463 }
 0x505   : > { %v467_v50 = vadd.f32 %v464_v48, %v457_v46 }
 0x507   : > { %v469_v52 = vmul.f32 0.5, %v467_v50  ;;  %v460_v53 = vpop.permute.xlu1 %459 }
 0x508   : > { %v466_v54 = vadd.f32 %v460_v53, %v456_v51  ;;  %v498_v14 = vpop.permute.xlu0 %497 }
 0x509   : > { %873 = vtanh.f32 %v469_v52 }
 0x50a   : > { %v468_v55 = vmul.f32 0.5, %v466_v54 }
 0x50c   : > { %875 = vtanh.f32 %v468_v55 }
 0x513   : > { %v874_v56 = vpop.eup %873 }
 0x514   : > { %v473_v58 = vmul.f32 0.5, %v874_v56 }
 0x516   : > { %v876_v59 = vpop.eup %875  ;;  %v475_v60 = vadd.f32 0.5, %v473_v58 }
 0x517   : > { %v472_v47 = vmul.f32 0.5, %v876_v59 }
 0x518   : > { %v477_v62 = vmul.f32 %v475_v60, %v467_v50 }
 0x519   : > { %v474_v61 = vadd.f32 0.5, %v472_v47 }
 0x51b   : > { %v476_v63 = vmul.f32 %v474_v61, %v466_v54 }
 0x51d   : > { %v856_v0 = vpack.i.bf16 %v477_v62, %v476_v63  ;;  %v494_v44 = vpack.c.bf16 %v477_v62, %v476_v63 }
 0x51f   : > { %857 = vrot.lane.b32.xlu1 %v856_v0, %s984_s16 }
 0x523   : > { %862 = vrot.lane.b32.xlu1 %v856_v0, %s987_s4 }
 0x527   : > { %501 = vperm.xlu1 %867, %v1172_v25  }
 0x591   : > { %v858_v4 = vpop.permute.xlu1 %857 }
 0x592   : > { %v860_v5 = vunpack.i.h.bf16 %v858_v4  ;;  %v859_v6 = vunpack.i.l.bf16 %v858_v4 }
 0x594   : > { %v680_v7 = vpack.c.bf16 %v860_v5, %v859_v6 }
 0x595   : > { %v863_v8 = vpop.permute.xlu1 %862 }
 0x596   : > { %726 = vmatpush3.bf16.msk.msra.mxu0 %vm1110_vm2, %v680_v7  ;;  %v865_v9 = vunpack.i.h.bf16 %v863_v8  ;;  %v864_v10 = vunpack.i.l.bf16 %v863_v8 }
 0x597   : > { %727 = vmatprep.subr.bf16.mxu0 %v983_v57 }
 0x598   : > { %v683_v11 = vpack.c.bf16 %v865_v9, %v864_v10 }
 0x59a   : > { %728 = vmatpush3.bf16.msra.mxu0 %v494_v44 }
 0x59b   : > { %729 = vmatprep.subr.bf16.mxu0 %v983_v57 }
 0x59e   : > { %730 = vmatpush3.bf16.msk.msra.mxu0 %vm1118_vm4, %v683_v11 }
 0x5a1   : > { %732 = vmatmul.mubr.msk.bf16.vlgmr.msra.gmra.mrb[0].mxu0 %vm222_vm5, %v868_v12 }
 0x5a6   : > { %v502_v15 = vpop.permute.xlu1 %501 }
 0x674   : > { %v546_v13 = vpop.f32.mrb[0].mxu0 }
 0x675   : > { %v547_v16 = vadd.f32 %v546_v13, %v498_v14  ;;  %v733_v17 = vpop.f32.mrb[1].mxu0 }
 0x676   : > { %v549_v18 = vpop.f32.mrb[2].mxu0 }
 0x677   : > { %v553_v20 = vmul.f32 0.1, %v547_v16  ;;  %v550_v21 = vadd.f32 %v549_v18, %v502_v15  ;;  %v734_v22 = vpop.f32.mrb[3].mxu0 }
 0x679   : > { %v555_v23 = vadd.f32 %v553_v20, %v1092_v1  ;;  %v554_v24 = vmul.f32 0.1, %v550_v21 }
 0x67b   : > { %557 = vst [vmem:[%s1145_s7] sm:$0xff] %v555_v23  ;;  %v556_v25 = vadd.f32 %v554_v24, %v1094_v2 }
 0x67d   : > { %558 = vst [vmem:[%s1145_s7 + $0x8] sm:$0xff] %v556_v25 }
 0x67e PF: > { %s692_s10 = sshll.u32 %s955_s15, 8  ;;  %s573_s24 = sshll.u32 %s1145_s7, 4  ;;  %s1200_s24 = int_to_ptr.vmem [resolvable:$true] %s573_s24 }
 0x67f   : > { %s1197_s21 = scalar_lea.hbm %s1259_s3, %s692_s10  ;;  %s1204_s25 = scalar_lea.sflag [#allocation5], %s173_s29 }
 0x680   : > { %s877_s30 = scalar_lea.vmem %s1200_s24, 256  ;;  %s988_s15 = smov [#allocation4]  }
 0x681   : > { %p878_p2 = scmp.ne.s32.totalorder %s1200_s24, %s877_s30  ;;  %s881_s5 = sshll.u32 %s988_s15, 4  ;;  %s882_s5 = int_to_ptr.vmem [resolvable:$false] %s881_s5 }
 0x682   : > { %s883_s6 = scalar_lea.vmem %s882_s5, 512  ;;  %p884_p6 = scmp.lt.s32.totalorder %s1200_s24, %s882_s5 }
 0x683   : > { %p879_p4 = pnand %p878_p2, %p1063_p3  ;;  %p885_p7 = scmp.lt.s32.totalorder %s883_s6, %s877_s30 }
 0x685   : > { %p880_p5 = pneg %p879_p4  ;;  %p886_p9 = por %p885_p7, %p884_p6 }
 0x687   : > { %p887_p10 = pnand %p886_p9, %p880_p5 }
 0x689   : > { %890 = shalt.err (!%p887_p10)
}
 0x68a   : > { %s891_s29 = scalar_lea.hbm %s1197_s21, 256  ;;  %s895_s4 = scalar_lea.hbm %s1259_s3, 1024 }
 0x68b   : > { %p892_p11 = scmp.ne.s32.totalorder %s1197_s21, %s891_s29  ;;  %p896_p0 = scmp.lt.u32.totalorder %s1197_s21, %s1259_s3 }
 0x68c   : > { %p897_p1 = scmp.lt.u32.totalorder %s895_s4, %s891_s29  ;;  %p899_p4 = scmp.lt.u32.totalorder %s891_s29, %s1197_s21 }
 0x68d   : > { %p893_p12 = pnand %p892_p11, %p1063_p3 }
 0x68e   : > { %p898_p2 = por %p897_p1, %p896_p0 }
 0x68f   : > { %p894_p13 = pneg %p893_p12 }
 0x690   : > { %p900_p5 = por %p899_p4, %p898_p2 }
 0x692   : > { %p901_p6 = pnand %p900_p5, %p894_p13 }
 0x694   : > { %904 = shalt.err (!%p901_p6)
}
 0x695   : > { %s989_s10 = smov 128   ;;  %s990_s11 = smov 8  }
 0x696   : > { %737 = dma.vmem_to_hbm [thread:$0]  (%p1063_p3), %s1200_s24, 256, %s1197_s21, %s1204_s25, %s989_s10, %s989_s10, %s990_s11  }
 0x697 PF: > { %p743_p7 = scmp.ge.s32.totalorder %s971_s19, 2  ;;  %s588_s20 = sand.u32 1, %s943_s12  }
 0x698   : > { %s589_s30 = scalar_lea.sflag [#allocation5], %s588_s20 }
 0x699   : > { %p740_p9 = pnand %p743_p7, %p1074_p8 }
 0x69b   : > { %938 = dma.done.wait (!%p740_p9), %s589_s30, 256  }
 0x69c   : > { %940 = vsyncadd (!%p740_p9), %s589_s30, 4294967040  ;;  %s16_s19 = sadd.s32 1, %s971_s19   ;;  %s1266_s12 = smov %s947_s13 }
 0x69d   : > { %p13_p10 = scmp.ge.s32.totalorder %s16_s19, 10   ;;  %s1267_s13 = smov %s951_s14 }
 0x69e   : > { %s1268_s14 = smov %s1072_s27  ;;  %s1269_s15 = smov %s963_s17 }
 0x69f   : > { %s1270_s16 = smov %s967_s18  ;;  %s1271_s17 = smov %s1274_s22 }
 0x6a0   : > { %s1272_s18 = smov %s1278_s23  ;;  %15 = sbr.rel (!%p13_p10) target bundleno = 5 (0x5), region = 81 }
 0x6a7   :  { %594 = vsyncpa [#allocation5], 1 }
 0x6a8   :  { %596 = vsyncpa [#allocation5 + $0x1], 1 }

</bundles_post_ra>
